<compile_context>
chip_gen: v7x
topology: tpu7x:2x2x1
jax: 0.10.0
libtpu: 0.0.40
codegen_flags: <defaults>
</compile_context>

<pallas_src>
import functools

import jax
import jax.numpy as jnp
from jax.experimental import pallas as pl
from jax.experimental.pallas import tpu as pltpu


def _round_up(x, m):
    return ((x + m - 1) // m) * m


def _vmem_limit_bytes():
    """Scoped VMEM limit: ~75% of physical capacity (48 MiB v7x, 96 MiB v6e/v5e)."""
    try:
        cap = pltpu.get_tpu_info().vmem_capacity_bytes
    except Exception:
        cap = 64 * 1024 * 1024  # v7x-safe fallback
    return int(cap) * 3 // 4


def _working_set_bytes(tm, tk, tn, x_bytes, w_bytes, out_bytes, k_tiles):
    ws = 2 * tm * tk * x_bytes       # x tile, double-buffered
    ws += 2 * tk * tn * w_bytes      # weight tile, double-buffered
    ws += 2 * tn * 4                 # bias tile (f32), double-buffered
    ws += 2 * tm * tn * out_bytes    # output tile, double-buffered
    if k_tiles > 1:
        ws += tm * tn * 4            # persistent f32 accumulator scratch
    return ws


def _flatten_head_kernel_direct(x_ref, w_ref, b_ref, o_ref):
    # Single K pass: no accumulator, no init/finalize control flow.
    acc = jnp.dot(x_ref[...].astype(w_ref.dtype), w_ref[...],
                  preferred_element_type=jnp.float32)
    o_ref[...] = (acc + b_ref[...]).astype(o_ref.dtype)


def _flatten_head_kernel_acc(x_ref, w_ref, b_ref, o_ref, acc_ref):
    # K-tiled path: f32 accumulator persistent across the innermost K axis.
    k = pl.program_id(2)

    @pl.when(k == 0)
    def _init():
        acc_ref[...] = jnp.zeros_like(acc_ref)

    acc_ref[...] += jnp.dot(x_ref[...].astype(w_ref.dtype), w_ref[...],
                            preferred_element_type=jnp.float32)

    @pl.when(k == pl.num_programs(2) - 1)
    def _finalize():
        o_ref[...] = (acc_ref[...] + b_ref[...]).astype(o_ref.dtype)


def prepare_flatten_head_params(weight, bias, compute_dtype=jnp.bfloat16):
    """One-time parameter prep (hoisted out of the per-call hot path).

    weight: [target_window, nf]  (PyTorch nn.Linear layout)
    bias:   [target_window]

    Returns:
      w_t: [nf, N_pad] in compute_dtype (pre-transposed; lane dim padded to a
           multiple of 128 so kernel stores stay lane-dense / unmasked)
      b:   [1, N_pad] float32
    """
    n_out, nf = weight.shape
    n_pad = _round_up(n_out, 128)
    w_t = jnp.asarray(weight).T.astype(compute_dtype)          # [nf, n_out]
    b = jnp.asarray(bias, jnp.float32).reshape(1, n_out)
    if n_pad != n_out:
        w_t = jnp.pad(w_t, ((0, 0), (0, n_pad - n_out)))
        b = jnp.pad(b, ((0, 0), (0, n_pad - n_out)))
    return w_t, b


@functools.partial(jax.jit, static_argnames=("target_window",))
def flatten_head(x, w_t, b, *, target_window):
    """FlattenHead forward.

    x:   [bs, n_vars, d_model, patch_num]
    w_t: [nf, N_pad]  (from prepare_flatten_head_params)
    b:   [1, N_pad]   (from prepare_flatten_head_params)
    returns [bs, n_vars, target_window]
    """
    bs, n_vars, d_model, patch_num = x.shape
    K = d_model * patch_num
    M = bs * n_vars
    N = target_window
    assert w_t.shape[0] == K, "weight was prepared for a different nf"
    N_pad = w_t.shape[1]
    assert N_pad % 128 == 0 and b.shape == (1, N_pad)

    out_dtype = x.dtype
    x_bytes = jnp.dtype(x.dtype).itemsize
    w_bytes = jnp.dtype(w_t.dtype).itemsize
    out_bytes = jnp.dtype(out_dtype).itemsize

    # Flatten last two dims (row-major == torch.flatten(start_dim=-2) for
    # contiguous x) and collapse batch dims into GEMM rows.
    x2d = x.reshape(M, K)

    # ---- Tile selection (static, at trace time) --------------------------
    vmem_limit = _vmem_limit_bytes()
    budget = vmem_limit * 85 // 100          # headroom under the scoped limit

    # M: one full-row tile when small (typical for this head); only pad /
    # tile M when it is large.
    M_pad = M if M % 8 == 0 else _round_up(M, 8)
    if M_pad <= 1024:
        tm = M_pad
    else:
        tm = 512
        M_pad = _round_up(M_pad, tm)
    m_tiles = M_pad // tm

    # N: lane-dense tiles. If M is a single tile, split N in two (when it
    # stays a 128-multiple) so a "parallel" grid axis exists for v7x's 2 TCs.
    tn = N_pad
    if m_tiles == 1 and N_pad % 256 == 0:
        tn = N_pad // 2
    n_tiles = N_pad // tn

    # K: prefer a single pass (tk = K, no accumulator). Otherwise the largest
    # 128-multiple divisor of K that fits (no K padding of x). Padding K is
    # only a last resort.
    def fits(tk, k_tiles):
        return _working_set_bytes(tm, tk, tn, x_bytes, w_bytes, out_bytes,
                                  k_tiles) <= budget

    pad_k = False
    if fits(K, 1):
        tk, k_tiles = K, 1
    else:
        tk = None
        for d in range(K // 128, 0, -1):
            cand = d * 128
            if K % cand == 0 and fits(cand, K // cand):
                tk = cand
                break
        if tk is not None:
            k_tiles = K // tk
        else:
            # TODO(synk): rare fallback — K has no 128-multiple divisor that
            # fits VMEM; pad K (costs one extra copy of x per call).
            tk = 512
            while tk > 128 and not fits(tk, 2):
                tk //= 2
            pad_k = True
            k_tiles = _round_up(K, tk) // tk
    K_pad = k_tiles * tk

    if M_pad != M or (pad_k and K_pad != K):
        x2d = jnp.pad(x2d, ((0, M_pad - M), (0, K_pad - K)))
    w2d = w_t
    if pad_k and K_pad != K:
        w2d = jnp.pad(w_t, ((0, K_pad - K), (0, 0)))

    # Advisory cost estimate reflecting the actual DMA traffic of this grid.
    x_reads = n_tiles if k_tiles > 1 else 1
    cost = pl.CostEstimate(
        flops=2 * M_pad * K_pad * N_pad,
        transcendentals=0,
        bytes_accessed=(M_pad * K_pad * x_bytes * x_reads
                        + K_pad * N_pad * w_bytes * m_tiles
                        + N_pad * 4
                        + M_pad * N_pad * out_bytes),
    )

    if k_tiles == 1:
        grid = (m_tiles, n_tiles)
        in_specs = [
            pl.BlockSpec((tm, K_pad), lambda i, j: (i, 0)),
            pl.BlockSpec((K_pad, tn), lambda i, j: (0, j)),
            pl.BlockSpec((1, tn), lambda i, j: (0, j)),
        ]
        out_spec = pl.BlockSpec((tm, tn), lambda i, j: (i, j))
        kernel = _flatten_head_kernel_direct
        scratch = []
        semantics = ("parallel", "parallel")
    else:
        grid = (m_tiles, n_tiles, k_tiles)
        in_specs = [
            pl.BlockSpec((tm, tk), lambda i, j, k: (i, k)),
            pl.BlockSpec((tk, tn), lambda i, j, k: (k, j)),
            pl.BlockSpec((1, tn), lambda i, j, k: (0, j)),
        ]
        out_spec = pl.BlockSpec((tm, tn), lambda i, j, k: (i, j))
        kernel = _flatten_head_kernel_acc
        scratch = [pltpu.VMEM((tm, tn), jnp.float32)]
        semantics = ("parallel", "parallel", "arbitrary")

    out_padded = pl.pallas_call(
        kernel,
        out_shape=jax.ShapeDtypeStruct((M_pad, N_pad), out_dtype),
        grid_spec=pltpu.PrefetchScalarGridSpec(
            num_scalar_prefetch=0,
            grid=grid,
            in_specs=in_specs,
            out_specs=out_spec,
            scratch_shapes=scratch,
        ),
        compiler_params=pltpu.CompilerParams(
            dimension_semantics=semantics,
            vmem_limit_bytes=vmem_limit,
        ),
        cost_estimate=cost,
    )(x2d, w2d, b)

    # Strip padding (no-op when nothing was padded).
    out = out_padded
    if M_pad != M or N_pad != N:
        out = out[:M, :N]
    # TODO(synk): head_dropout > 0 (training-mode dropout) not implemented;
    # p=0 / eval mode is the identity, which matches the module default.
    return out.reshape(bs, n_vars, N)


if __name__ == "__main__":
    # Small shapes consistent with the module.
    bs, n_vars, d_model, patch_num = 2, 4, 16, 8
    nf = d_model * patch_num            # 128
    target_window = 32

    key = jax.random.PRNGKey(0)
    kx, kw, kb = jax.random.split(key, 3)

    x = jax.random.normal(kx, (bs, n_vars, d_model, patch_num), dtype=jnp.float32)

    # Deterministic parameter init (uniform, like nn.Linear default bounds).
    bound = 1.0 / (nf ** 0.5)
    weight = jax.random.uniform(kw, (target_window, nf), jnp.float32, -bound, bound)
    bias = jax.random.uniform(kb, (target_window,), jnp.float32, -bound, bound)

    # One-time parameter prep (transpose + bf16 cast + lane padding hoisted).
    w_t, b_p = prepare_flatten_head_params(weight, bias)

    out = flatten_head(x, w_t, b_p, target_window=target_window)
    out = jax.block_until_ready(out)

    # Reference: same math with bf16-rounded operands and f32 accumulation
    # (matches the kernel's compute dtype).
    x_bf = x.reshape(bs, n_vars, nf).astype(jnp.bfloat16).astype(jnp.float32)
    w_bf = weight.astype(jnp.bfloat16).astype(jnp.float32)
    ref = x_bf @ w_bf.T + bias

    assert out.shape == (bs, n_vars, target_window)
    assert out.dtype == x.dtype
    assert jnp.allclose(out, ref, atol=2e-3, rtol=2e-3), float(
        jnp.max(jnp.abs(out - ref)))

    print("KERNEL_OK")
</pallas_src>

<mosaic_0001>
module attributes {stable_mosaic.version = 11 : i64} {
  func.func @_flatten_head_kernel_direct(%arg0: i32, %arg1: i32, %arg2: memref<8x128xf32, #tpu.memory_space<vmem>>, %arg3: memref<128x128xbf16, #tpu.memory_space<vmem>>, %arg4: memref<1x128xf32, #tpu.memory_space<vmem>>, %arg5: memref<8x128xf32, #tpu.memory_space<vmem>>) attributes {dimension_semantics = [#tpu.dimension_semantics<parallel>, #tpu.dimension_semantics<parallel>], iteration_bounds = array<i64: 1, 1>, scalar_prefetch = 0 : i64, scratch_operands = 0 : i64, tpu.core_type = #tpu.core_type<tc>, window_params = [{transform_indices = @transform_0, window_bounds = array<i64: 8, 128>}, {transform_indices = @transform_1, window_bounds = array<i64: 128, 128>}, {transform_indices = @transform_2, window_bounds = array<i64: 1, 128>}, {transform_indices = @transform_3, window_bounds = array<i64: 8, 128>}]} {
    %c0 = arith.constant 0 : index
    %c0_0 = arith.constant 0 : index
    %0 = vector.load %arg2[%c0, %c0_0] : memref<8x128xf32, #tpu.memory_space<vmem>>, vector<8x128xf32>
    %1 = arith.truncf %0 : vector<8x128xf32> to vector<8x128xbf16>
    %c0_1 = arith.constant 0 : index
    %c0_2 = arith.constant 0 : index
    %2 = vector.load %arg3[%c0_1, %c0_2] : memref<128x128xbf16, #tpu.memory_space<vmem>>, vector<128x128xbf16>
    %cst = arith.constant dense<0.000000e+00> : vector<8x128xf32>
    %3 = tpu.matmul %1, %2, %cst {dimension_numbers = #tpu.dot_dimension_numbers<[1], [0], [0], [1], [0, 0, 1, 1], [], []>} : vector<8x128xbf16>, vector<128x128xbf16>, vector<8x128xf32> -> vector<8x128xf32>
    %c0_3 = arith.constant 0 : index
    %c0_4 = arith.constant 0 : index
    %4 = vector.load %arg4[%c0_3, %c0_4] : memref<1x128xf32, #tpu.memory_space<vmem>>, vector<1x128xf32>
    %5 = vector.broadcast %4 : vector<1x128xf32> to vector<8x128xf32>
    %6 = arith.addf %3, %5 : vector<8x128xf32>
    %c0_5 = arith.constant 0 : index
    %c0_6 = arith.constant 0 : index
    %7 = vector.load %arg5[%c0_5, %c0_6] : memref<8x128xf32, #tpu.memory_space<vmem>>, vector<8x128xf32>
    tpu.vector_store %arg5[%c0_5, %c0_6], %6 {strides = array<i32>} : memref<8x128xf32, #tpu.memory_space<vmem>>, vector<8x128xf32>,
    return
  }
  func.func @transform_0(%arg0: i32, %arg1: i32) -> (i32, i32) {
    %c0_i32 = arith.constant 0 : i32
    %c0_i32_0 = arith.constant 0 : i32
    return %arg0, %c0_i32 : i32, i32
  }
  func.func @transform_1(%arg0: i32, %arg1: i32) -> (i32, i32) {
    %c0_i32 = arith.constant 0 : i32
    %c0_i32_0 = arith.constant 0 : i32
    return %c0_i32, %arg1 : i32, i32
  }
  func.func @transform_2(%arg0: i32, %arg1: i32) -> (i32, i32) {
    %c0_i32 = arith.constant 0 : i32
    %c0_i32_0 = arith.constant 0 : i32
    return %c0_i32, %arg1 : i32, i32
  }
  func.func @transform_3(%arg0: i32, %arg1: i32) -> (i32, i32) {
    %c0_i32 = arith.constant 0 : i32
    return %arg0, %arg1 : i32, i32
  }
}

</mosaic_0001>

<bundles_post_ra>
// kernel: flatten_head.1
= control target key start
LH: loop header
LB: loop body
LE: loop exit
PB: predicated region body
PF: predicated region fallthrough
CT: control target
= control target key end

     0   :  { %v217_v1 = vmov 0.0   ;;  %vm218_vm0 = vmmov 0   ;;  %s282_s0 = inlined_call_operand.vmem [shape: f32[8,128], index: 0, kind: input, shape index: {}]   ;;  %s283_s1 = inlined_call_operand.vmem [shape: bf16[128,128], index: 1, kind: input, shape index: {}]   ;;  %s284_s2 = inlined_call_operand.vmem [shape: f32[1,128], index: 2, kind: input, shape index: {}]   ;;  %s285_s3 = inlined_call_operand.hbm [shape: f32[8,128], index: 3, kind: output, shape index: {}]  }
   0x1   :  { %v185_v0 = vld [vmem:[%s283_s1] sm:$0xff]   ;;  %162 = vmatprep.subr.bf16.mxu0 %v217_v1  ;;  %v186_v2 = vld [vmem:[%s283_s1 + $0x8] sm:$0xff]   ;;  %178 = vmatprep.mubr.msk.bf16.mxu0 %vm218_vm0, %v217_v1  ;;  %v187_v3 = vld [vmem:[%s283_s1 + $0x10] sm:$0xff]  }
   0x2   :  { %163 = vmatpush3.bf16.msra.mxu0 %v185_v0 }
   0x3   :  { %164 = vmatprep.subr.bf16.mxu0 %v217_v1 }
   0x6   :  { %165 = vmatpush3.bf16.msra.mxu0 %v186_v2 }
   0x7   :  { %166 = vmatprep.subr.bf16.mxu0 %v217_v1 }
   0x8   :  { %8 = vsyncpa [#allocation3], 0  ;;  %v188_v4 = vld [vmem:[%s283_s1 + $0x18] sm:$0xff]   ;;  %v189_v5 = vld [vmem:[%s283_s1 + $0x20] sm:$0xff]   ;;  %s219_s5 = smov [#allocation2]  }
   0x9   :  { %v190_v6 = vld [vmem:[%s283_s1 + $0x28] sm:$0xff]   ;;  %v191_v7 = vld [vmem:[%s283_s1 + $0x30] sm:$0xff]   ;;  %v192_v8 = vld [vmem:[%s283_s1 + $0x38] sm:$0xff]   ;;  %s136_s6 = sshll.u32 %s219_s5, 4  ;;  %s137_s6 = int_to_ptr.vmem [resolvable:$true] %s136_s6 }
   0xa   :  { %167 = vmatpush3.bf16.msra.mxu0 %v187_v3  ;;  %v16_v9 = vld [vmem:[%s282_s0] sm:$0xff]  ;;  %s193_s1 = scalar_lea.vmem %s137_s6, 128  ;;  %p198_p1 = scmp.lt.s32.totalorder %s137_s6, %s137_s6 }
   0xb   :  { %168 = vmatprep.subr.bf16.mxu0 %v217_v1  ;;  %v17_v10 = vpack.c.bf16 %v16_v9, %v16_v9  ;;  %v144_v11 = vld [vmem:[%s284_s2] ss:$0 sm:$0xff]  ;;  %p194_p0 = scmp.ne.s32.totalorder %s137_s6, %s193_s1  ;;  %p199_p2 = scmp.lt.s32.totalorder %s193_s1, %s193_s1 }
   0xd   :  { %p200_p3 = por %p199_p2, %p198_p1 }
   0xe   :  { %169 = vmatpush3.bf16.msra.mxu0 %v188_v4 }
   0xf   :  { %170 = vmatprep.subr.bf16.mxu0 %v217_v1  ;;  %p201_p4 = pnand %p200_p3, %p194_p0 }
  0x12   :  { %171 = vmatpush3.bf16.msra.mxu0 %v189_v5 }
  0x13   :  { %172 = vmatprep.subr.bf16.mxu0 %v217_v1 }
  0x16   :  { %173 = vmatpush3.bf16.msra.mxu0 %v190_v6 }
  0x17   :  { %174 = vmatprep.subr.bf16.mxu0 %v217_v1 }
  0x1a   :  { %175 = vmatpush3.bf16.msra.mxu0 %v191_v7 }
  0x1b   :  { %176 = vmatprep.subr.bf16.mxu0 %v217_v1 }
  0x1e   :  { %177 = vmatpush3.bf16.msra.mxu0 %v192_v8 }
  0x21   :  { %179 = vmatmul.mubr.bf16.vlgmr.msra.gmra.mrb[0].mxu0 %v17_v10 }
  0xf4   :  { %v123_v12 = vpop.f32.mrb[0].mxu0 }
  0xf5   :  { %v124_v13 = vadd.f32 %v144_v11, %v123_v12  ;;  %v180_v14 = vpop.f32.mrb[1].mxu0 }
  0xf6   :  { %v126_v15 = vpop.f32.mrb[2].mxu0 }
  0xf7   :  { %129 = vst [vmem:[#allocation2] sm:$0xff] %v124_v13  ;;  %v181_v16 = vpop.f32.mrb[3].mxu0 }
  0xf8   :  { %204 = shalt.err (!%p201_p4)
}
  0xf9   :  { %s205_s2 = scalar_lea.hbm %s285_s3, 128 }
  0xfa   :  { %p206_p5 = scmp.ne.s32.totalorder %s285_s3, %s205_s2  ;;  %p209_p6 = scmp.lt.u32.totalorder %s205_s2, %s285_s3 }
  0xfc   :  { %p211_p7 = pnand %p209_p6, %p206_p5 }
  0xfe   :  { %214 = shalt.err (!%p211_p7)
}
  0xff   :  { %139 = dma.vmem_to_hbm [thread:$0]  %s137_s6, 128, %s285_s3, [#allocation3]  }
 0x100   :  { %215 = dma.done.wait [#allocation3], 128  }
 0x101   :  { %216 = vsyncadd [#allocation3], 4294967168 }
 0x102   :  { %143 = vsyncpa [#allocation3], 1 }

</bundles_post_ra>
